<compile_context>
chip_gen: v6e
topology: v6e:2x2x1
jax: 0.10.0
libtpu: 0.0.40
codegen_flags: <defaults>
</compile_context>

<pallas_src>
import jax
import jax.numpy as jnp
from jax.experimental import pallas as pl
from jax.experimental.pallas import tpu as pltpu


NEG_SLOPE = 0.01   # PyTorch nn.LeakyReLU default negative_slope
LANE = 128
SUBLANE = 8


def _round_up(n, m):
    return ((n + m - 1) // m) * m


def _leaky_relu(v):
    return jnp.where(v > 0, v, NEG_SLOPE * v)


def heightmap_encoder_kernel(x_ref, w1_ref, b1_ref, w2_ref, b2_ref, out_ref):
    # Layer 1: Linear + LeakyReLU (MXU matmul, f32 accumulation; epilogue in f32)
    h = jnp.dot(x_ref[...].astype(w1_ref.dtype), w1_ref[...],
                preferred_element_type=jnp.float32)
    h = _leaky_relu(h + b1_ref[...])            # b1 is (1, F1) -> broadcasts over rows

    # Layer 2: Linear + LeakyReLU (cast activations to the weight dtype for the MXU)
    o = jnp.dot(h.astype(w2_ref.dtype), w2_ref[...],
                preferred_element_type=jnp.float32)
    o = _leaky_relu(o + b2_ref[...])

    out_ref[...] = o.astype(out_ref.dtype)


def prepare_params(w1, b1, w2, b2, *, compute_dtype=jnp.float32):
    """Pad the hidden feature dim to a lane multiple ONCE at init (exact: zero rows/cols).

    w1: (in, f1); b1: (f1,); w2: (f1, f2); b2: (f2,).
    Returns (w1p, b1p, w2p, b2p) with hidden dim padded to a multiple of 128 and
    weights cast to `compute_dtype` (biases stay f32 for the epilogue).
    """
    f1 = w1.shape[1]
    F1 = _round_up(f1, LANE)
    w1p = jnp.pad(w1.astype(compute_dtype), ((0, 0), (0, F1 - f1)))
    b1p = jnp.pad(b1.astype(jnp.float32).reshape(1, f1), ((0, 0), (0, F1 - f1)))
    w2p = jnp.pad(w2.astype(compute_dtype), ((0, F1 - f1), (0, 0)))
    b2p = b2.astype(jnp.float32).reshape(1, -1)
    return w1p, b1p, w2p, b2p


def heightmap_encoder(x, w1p, b1p, w2p, b2p, *, block_b=4096,
                      compute_dtype=None, out_dtype=None):
    """x: (B, in_channels). w1p/b1p/w2p/b2p: padded params from prepare_params().

    compute_dtype: optionally cast x (e.g. jnp.bfloat16) to match bf16-prepared
    weights and halve x HBM bytes; accumulation and the epilogue stay f32.
    (Ideally the producer already emits x in the compute dtype.)
    """
    B, in_ch = x.shape
    F1 = w1p.shape[1]          # padded hidden width (lane multiple)
    f2 = w2p.shape[1]          # TRUE output width (written unpadded)
    out_dtype = out_dtype if out_dtype is not None else x.dtype

    if compute_dtype is not None and x.dtype != compute_dtype:
        x = x.astype(compute_dtype)

    # --- batch tiling (no x padding; Pallas handles the ragged final block) --------
    # Big tiles amortize per-step overhead; cap at ceil(B/2) so v7x gets >=2 grid
    # steps (dual-TC) whenever the batch is larger than one tile.
    half_b = _round_up(max(pl.cdiv(B, 2), SUBLANE), SUBLANE)
    tb = min(_round_up(block_b, SUBLANE), half_b)
    grid = (pl.cdiv(B, tb),)
    # Double-buffered tile bytes ~= 2*tb*(in_ch + 128)*4 B -> ~4-5 MiB at tb=4096,
    # well under the 32 MiB default scoped-VMEM limit on every generation, so no
    # vmem_limit_bytes override is needed at the default tile size.

    # --- cost hint for XLA scheduling around the custom call ------------------------
    flops = 2 * B * (in_ch * F1 + F1 * f2)
    bytes_accessed = (
        x.size * x.dtype.itemsize
        + w1p.size * w1p.dtype.itemsize + w2p.size * w2p.dtype.itemsize
        + b1p.size * b1p.dtype.itemsize + b2p.size * b2p.dtype.itemsize
        + B * f2 * jnp.dtype(out_dtype).itemsize)
    cost = pl.CostEstimate(flops=flops, transcendentals=0,
                           bytes_accessed=bytes_accessed)

    out = pl.pallas_call(
        heightmap_encoder_kernel,
        out_shape=jax.ShapeDtypeStruct((B, f2), out_dtype),
        grid_spec=pltpu.PrefetchScalarGridSpec(
            num_scalar_prefetch=0,
            grid=grid,
            in_specs=[
                pl.BlockSpec((tb, in_ch), lambda i: (i, 0)),    # x tile streams over batch
                pl.BlockSpec((in_ch, F1), lambda i: (0, 0)),    # weights stay VMEM-resident
                pl.BlockSpec((1, F1), lambda i: (0, 0)),
                pl.BlockSpec((F1, f2), lambda i: (0, 0)),
                pl.BlockSpec((1, f2), lambda i: (0, 0)),
            ],
            out_specs=pl.BlockSpec((tb, f2), lambda i: (i, 0)),  # true-width output
        ),
        compiler_params=pltpu.CompilerParams(
            dimension_semantics=("parallel",)),   # dual-TC on v7x; no-op on v5e/v6e
        cost_estimate=cost,
    )(x, w1p, b1p, w2p, b2p)

    return out


def init_params(key, in_channels, encoder_features=(80, 60)):
    """Deterministic synthetic init (Kaiming-uniform-ish); weights stored as (in, out)."""
    params = []
    fan_in = in_channels
    for feat in encoder_features:
        key, kw, kb = jax.random.split(key, 3)
        bound = 1.0 / jnp.sqrt(fan_in)
        w = jax.random.uniform(kw, (fan_in, feat), jnp.float32, -bound, bound)
        b = jax.random.uniform(kb, (feat,), jnp.float32, -bound, bound)
        params.append((w, b))
        fan_in = feat
    return params


def _reference(x, w1, b1, w2, b2):
    r = x @ w1 + b1
    r = jnp.where(r > 0, r, NEG_SLOPE * r)
    r = r @ w2 + b2
    return jnp.where(r > 0, r, NEG_SLOPE * r)


if __name__ == "__main__":
    key = jax.random.PRNGKey(0)
    B = 16
    in_channels = 32            # flattened heightmap features (small demo shape)
    encoder_features = (80, 60)

    key, kx = jax.random.split(key)
    x = jax.random.normal(kx, (B, in_channels), jnp.float32)
    (w1, b1), (w2, b2) = init_params(key, in_channels, encoder_features)
    ref = _reference(x, w1, b1, w2, b2)

    # f32 path (hidden-dim padding hoisted into prepare_params, done once).
    params_f32 = prepare_params(w1, b1, w2, b2)
    out = jax.block_until_ready(heightmap_encoder(x, *params_f32))
    assert out.shape == (B, encoder_features[-1])
    assert jnp.allclose(out, ref, atol=1e-4, rtol=1e-4)

    # bf16 compute path (halves HBM traffic); f32 accumulation/epilogue -> loose tol.
    params_bf16 = prepare_params(w1, b1, w2, b2, compute_dtype=jnp.bfloat16)
    out_bf16 = jax.block_until_ready(
        heightmap_encoder(x, *params_bf16, compute_dtype=jnp.bfloat16,
                          out_dtype=jnp.float32))
    assert out_bf16.shape == (B, encoder_features[-1])
    assert jnp.allclose(out_bf16, ref, atol=5e-2, rtol=5e-2)

    # Ragged batch (B not a multiple of the tile) exercises the cdiv grid / no-pad path.
    B2 = 13
    x2 = jax.random.normal(jax.random.PRNGKey(1), (B2, in_channels), jnp.float32)
    out2 = jax.block_until_ready(heightmap_encoder(x2, *params_f32))
    ref2 = _reference(x2, w1, b1, w2, b2)
    assert out2.shape == (B2, encoder_features[-1])
    assert jnp.allclose(out2, ref2, atol=1e-4, rtol=1e-4)

    print("KERNEL_OK")
</pallas_src>

<mosaic_0001>
module attributes {stable_mosaic.version = 11 : i64} {
  func.func @heightmap_encoder_kernel(%arg0: i32, %arg1: memref<8x32xf32, #tpu.memory_space<vmem>>, %arg2: memref<32x128xf32, #tpu.memory_space<vmem>>, %arg3: memref<1x128xf32, #tpu.memory_space<vmem>>, %arg4: memref<128x60xf32, #tpu.memory_space<vmem>>, %arg5: memref<1x60xf32, #tpu.memory_space<vmem>>, %arg6: memref<8x60xf32, #tpu.memory_space<vmem>>) attributes {dimension_semantics = [#tpu.dimension_semantics<parallel>], iteration_bounds = array<i64: 2>, scalar_prefetch = 0 : i64, scratch_operands = 0 : i64, tpu.core_type = #tpu.core_type<tc>, window_params = [{transform_indices = @transform_0, window_bounds = array<i64: 8, 32>}, {pipeline_mode = #tpu.pipeline_mode<synchronous>, transform_indices = @transform_1, window_bounds = array<i64: 32, 128>}, {pipeline_mode = #tpu.pipeline_mode<synchronous>, transform_indices = @transform_2, window_bounds = array<i64: 1, 128>}, {pipeline_mode = #tpu.pipeline_mode<synchronous>, transform_indices = @transform_3, window_bounds = array<i64: 128, 60>}, {pipeline_mode = #tpu.pipeline_mode<synchronous>, transform_indices = @transform_4, window_bounds = array<i64: 1, 60>}, {transform_indices = @transform_5, window_bounds = array<i64: 8, 60>}]} {
    %c0 = arith.constant 0 : index
    %c0_0 = arith.constant 0 : index
    %0 = vector.load %arg1[%c0, %c0_0] : memref<8x32xf32, #tpu.memory_space<vmem>>, vector<8x32xf32>
    %c0_1 = arith.constant 0 : index
    %c0_2 = arith.constant 0 : index
    %1 = vector.load %arg2[%c0_1, %c0_2] : memref<32x128xf32, #tpu.memory_space<vmem>>, vector<32x128xf32>
    %cst = arith.constant dense<0.000000e+00> : vector<8x128xf32>
    %2 = tpu.matmul %0, %1, %cst {dimension_numbers = #tpu.dot_dimension_numbers<[1], [0], [0], [1], [0, 0, 1, 1], [], []>} : vector<8x32xf32>, vector<32x128xf32>, vector<8x128xf32> -> vector<8x128xf32>
    %c0_3 = arith.constant 0 : index
    %c0_4 = arith.constant 0 : index
    %3 = vector.load %arg3[%c0_3, %c0_4] : memref<1x128xf32, #tpu.memory_space<vmem>>, vector<1x128xf32>
    %4 = vector.broadcast %3 : vector<1x128xf32> to vector<8x128xf32>
    %5 = arith.addf %2, %4 : vector<8x128xf32>
    %cst_5 = arith.constant 0.000000e+00 : f32
    %6 = vector.broadcast %cst_5 : f32 to vector<8x128xf32>
    %7 = arith.cmpf ogt, %5, %6 : vector<8x128xf32>
    %cst_6 = arith.constant 0.00999999977 : f32
    %8 = vector.broadcast %cst_6 : f32 to vector<8x128xf32>
    %9 = arith.mulf %8, %5 : vector<8x128xf32>
    %10 = arith.select %7, %5, %9 : vector<8x128xi1>, vector<8x128xf32>
    %c0_7 = arith.constant 0 : index
    %c0_8 = arith.constant 0 : index
    %11 = vector.load %arg4[%c0_7, %c0_8] : memref<128x60xf32, #tpu.memory_space<vmem>>, vector<128x60xf32>
    %cst_9 = arith.constant dense<0.000000e+00> : vector<8x60xf32>
    %12 = tpu.matmul %10, %11, %cst_9 {dimension_numbers = #tpu.dot_dimension_numbers<[1], [0], [0], [1], [0, 0, 1, 1], [], []>} : vector<8x128xf32>, vector<128x60xf32>, vector<8x60xf32> -> vector<8x60xf32>
    %c0_10 = arith.constant 0 : index
    %c0_11 = arith.constant 0 : index
    %13 = vector.load %arg5[%c0_10, %c0_11] : memref<1x60xf32, #tpu.memory_space<vmem>>, vector<1x60xf32>
    %14 = vector.broadcast %13 : vector<1x60xf32> to vector<8x60xf32>
    %15 = arith.addf %12, %14 : vector<8x60xf32>
    %cst_12 = arith.constant 0.000000e+00 : f32
    %16 = vector.broadcast %cst_12 : f32 to vector<8x60xf32>
    %17 = arith.cmpf ogt, %15, %16 : vector<8x60xf32>
    %cst_13 = arith.constant 0.00999999977 : f32
    %18 = vector.broadcast %cst_13 : f32 to vector<8x60xf32>
    %19 = arith.mulf %18, %15 : vector<8x60xf32>
    %20 = arith.select %17, %15, %19 : vector<8x60xi1>, vector<8x60xf32>
    %c0_14 = arith.constant 0 : index
    %c0_15 = arith.constant 0 : index
    %21 = vector.load %arg6[%c0_14, %c0_15] : memref<8x60xf32, #tpu.memory_space<vmem>>, vector<8x60xf32>
    tpu.vector_store %arg6[%c0_14, %c0_15], %20 {strides = array<i32>} : memref<8x60xf32, #tpu.memory_space<vmem>>, vector<8x60xf32>,
    return
  }
  func.func @transform_0(%arg0: i32) -> (i32, i32) {
    %c0_i32 = arith.constant 0 : i32
    %c0_i32_0 = arith.constant 0 : i32
    return %arg0, %c0_i32 : i32, i32
  }
  func.func @transform_1(%arg0: i32) -> (i32, i32) {
    %c0_i32 = arith.constant 0 : i32
    %c0_i32_0 = arith.constant 0 : i32
    %c0_i32_1 = arith.constant 0 : i32
    return %c0_i32, %c0_i32_0 : i32, i32
  }
  func.func @transform_2(%arg0: i32) -> (i32, i32) {
    %c0_i32 = arith.constant 0 : i32
    %c0_i32_0 = arith.constant 0 : i32
    %c0_i32_1 = arith.constant 0 : i32
    return %c0_i32, %c0_i32_0 : i32, i32
  }
  func.func @transform_3(%arg0: i32) -> (i32, i32) {
    %c0_i32 = arith.constant 0 : i32
    %c0_i32_0 = arith.constant 0 : i32
    %c0_i32_1 = arith.constant 0 : i32
    return %c0_i32, %c0_i32_0 : i32, i32
  }
  func.func @transform_4(%arg0: i32) -> (i32, i32) {
    %c0_i32 = arith.constant 0 : i32
    %c0_i32_0 = arith.constant 0 : i32
    %c0_i32_1 = arith.constant 0 : i32
    return %c0_i32, %c0_i32_0 : i32, i32
  }
  func.func @transform_5(%arg0: i32) -> (i32, i32) {
    %c0_i32 = arith.constant 0 : i32
    %c0_i32_0 = arith.constant 0 : i32
    return %arg0, %c0_i32 : i32, i32
  }
}

</mosaic_0001>

<bundles_post_ra>
// kernel: tpu_custom_call.1
= control target key start
LH: loop header
LB: loop body
LE: loop exit
PB: predicated region body
PF: predicated region fallthrough
CT: control target
= control target key end

     0   :  { %10 = vsyncpa [#allocation3], 0  ;;  %s880_s0 = inlined_call_operand.vmem [shape: f32[16,32], index: 0, kind: input, shape index: {}]   ;;  %s881_s1 = inlined_call_operand.vmem [shape: f32[32,128], index: 1, kind: input, shape index: {}]   ;;  %s882_s2 = inlined_call_operand.vmem [shape: f32[1,128], index: 2, kind: input, shape index: {}]   ;;  %s883_s3 = inlined_call_operand.vmem [shape: f32[128,60], index: 3, kind: input, shape index: {}]   ;;  %s884_s4 = inlined_call_operand.vmem [shape: f32[1,60], index: 4, kind: input, shape index: {}]   ;;  %s885_s5 = inlined_call_operand.hbm [shape: f32[16,60], index: 5, kind: output, shape index: {}]  }
   0x1   :  { %12 = vsyncpa [#allocation3 + $0x1], 0  ;;  %s697_s18 = smov 0   ;;  %s699_s19 = smov 0  }
   0x2   :  { %s701_s20 = smov 0   ;;  %s703_s21 = smov 0  }
   0x3 LB: > { %s718_s22 = sadd.s32 4294967295, %s662_s21   ;;  %s480_s23 = sadd.s32 4294967294, %s662_s21   ;;  %s662_s21 = sphi %s703_s21, %s891_s21   ;;  %s658_s20 = sphi %s701_s20, %s890_s20   ;;  %s654_s19 = sphi %s699_s19, %s889_s19   ;;  %s650_s18 = sphi %s697_s18, %s888_s18  }
   0x4   : > { %s722_s24 = sadd.s32 1, %s662_s21   ;;  %s135_s25 = sadd.s32 1, %s658_s20 }
   0x5   : > { %s132_s26 = ssub.s32 %s662_s21, %s722_s24  ;;  %p145_p0 = scmp.ne.s32.totalorder %s658_s20, %s654_s19 }
   0x6   : > { %p133_p1 = scmp.eq.s32.totalorder %s132_s26, 0  ;;  %p146_p2 = scmp.eq.s32.totalorder %s718_s22, 1 }
   0x7   : > { %p151_p3 = scmp.ne.s32.totalorder %s654_s19, %s650_s18  ;;  %p152_p4 = scmp.eq.s32.totalorder %s480_s23, 1 }
   0x8   : > { %s733_s27 = scalar_select %p133_p1, %s658_s20, %s135_s25  }
   0x9   : > { %p735_p5 = por %p146_p2, %p145_p0  ;;  %p739_p6 = por %p152_p4, %p151_p3 }
   0xa   : > { %p483_p7 = scmp.ge.s32.totalorder %s662_s21, 1  ;;  %p189_p8 = scmp.lt.s32.totalorder %s662_s21, 3 }
   0xc   : > { %p190_p9 = pnand %p483_p7, %p189_p8 }
   0xd   : > { %p216_p10 = scmp.lt.s32.totalorder (!%p190_p9), %s718_s22, 1  ;;  %s213_s26 = sand.u32 (!%p190_p9), 1, %s654_s19  }
   0xe   : > { %193 = sbr.rel (%p190_p9) target bundleno = 437 (0x1b5), region = 40  ;;  %s484_s30 = sshll.u32 (!%p190_p9), %s213_s26, 3 }
   0xf   : > { %s490_s8 = sshll.u32 (!%p190_p9), %s718_s22, 7  ;;  %s215_s9 = scalar_lea.vmem (!%p190_p9), [#allocation2], %s484_s30 }
  0x10   : > { %s421_s10 = sshll.u32 (!%p190_p9), %s215_s9, 4  ;;  %s845_s13 = scalar_lea.hbm (!%p190_p9), %s885_s5, %s490_s8  ;;  %s422_s10 = int_to_ptr.vmem [resolvable:$true] %s421_s10 }
  0x11   : > { %s408_s14 = scalar_lea.sflag (!%p190_p9), [#allocation3], %s213_s26  ;;  %s602_s15 = scalar_lea.vmem (!%p190_p9), %s422_s10, 128 }
  0x12   : > { %p603_p11 = scmp.ne.s32.totalorder (!%p190_p9), %s422_s10, %s602_s15 }
  0x13   : > { %v224_v0 = vld [vmem:[%s881_s1 + $0x18] sm:$0xff]  ;;  %v664_v1 = vmov 0.0   ;;  %v223_v2 = vld [vmem:[%s881_s1 + $0x10] sm:$0xff]  ;;  %vm665_vm0 = vmmov 0   ;;  %s217_s11 = scalar_select %p216_p10, %s718_s22, 1  ;;  %v222_v5 = vld [vmem:[%s881_s1 + $0x8] sm:$0xff] }
  0x14   : > { %515 = vmatprep.subr.mxu0 %v664_v1  ;;  %523 = vmatprep.mubr.msk.f32.mxu0 %vm665_vm0, %v664_v1  ;;  %v324_v3 = vld [vmem:[%s883_s3 + $0x78] sm:$0xff]  ;;  %v323_v4 = vld [vmem:[%s883_s3 + $0x70] sm:$0xff]  ;;  %v322_v6 = vld [vmem:[%s883_s3 + $0x68] sm:$0xff]  ;;  %vm232_vm1 = vcmask 261120   ;;  %vm405_vm4 = vcmask 490496   ;;  %p604_p12 = pnand %p603_p11, %p735_p5  ;;  %s666_s22 = smov [#allocation2]  }
  0x15   : > { %516 = vmatpush3.msra.mxu0 %v224_v0  ;;  %526 = vmatprep.subr.mxu1 %v664_v1  ;;  %s485_s16 = sshll.u32 %s217_s11, 3  ;;  %v221_v7 = vld [vmem:[%s881_s1] sm:$0xff]  ;;  %v320_v10 = vld [vmem:[%s883_s3 + $0x58] sm:$0xff]  ;;  %v319_v11 = vld [vmem:[%s883_s3 + $0x50] sm:$0xff] }
  0x16   : > { %517 = vmatprep.subr.mxu0 %v664_v1  ;;  %527 = vmatpush3.msra.mxu1 %v324_v3  ;;  %s219_s7 = scalar_lea.vmem %s880_s0, %s485_s16  ;;  %v321_v9 = vld [vmem:[%s883_s3 + $0x60] sm:$0xff]  ;;  %v318_v12 = vld [vmem:[%s883_s3 + $0x48] sm:$0xff]  ;;  %v316_v14 = vld [vmem:[%s883_s3 + $0x38] sm:$0xff]  ;;  %p605_p13 = pneg %p604_p12 }
  0x17   : > { %518 = vmatpush3.msra.mxu0 %v223_v2  ;;  %528 = vmatprep.subr.mxu1 %v664_v1  ;;  %v220_v8 = vld [vmem:[%s219_s7] sm:$0xff]  ;;  %v315_v15 = vld [vmem:[%s883_s3 + $0x30] sm:$0xff]  ;;  %v314_v16 = vld [vmem:[%s883_s3 + $0x28] sm:$0xff]  ;;  %s606_s16 = sshll.u32 %s666_s22, 4  ;;  %s607_s16 = int_to_ptr.vmem [resolvable:$false] %s606_s16 }
  0x18   : > { %519 = vmatprep.subr.mxu0 %v664_v1  ;;  %529 = vmatpush3.msra.mxu1 %v323_v4  ;;  %v317_v13 = vld [vmem:[%s883_s3 + $0x40] sm:$0xff]  ;;  %v312_v18 = vld [vmem:[%s883_s3 + $0x18] sm:$0xff]  ;;  %v311_v19 = vld [vmem:[%s883_s3 + $0x10] sm:$0xff]  ;;  %s608_s17 = scalar_lea.vmem %s607_s16, 256  ;;  %p609_p0 = scmp.lt.s32.totalorder %s422_s10, %s607_s16 }
  0x19   : > { %520 = vmatpush3.msra.mxu0 %v222_v5  ;;  %530 = vmatprep.subr.mxu1 %v664_v1  ;;  %v313_v17 = vld [vmem:[%s883_s3 + $0x20] sm:$0xff]  ;;  %v310_v20 = vld [vmem:[%s883_s3 + $0x8] sm:$0xff]  ;;  %p610_p1 = scmp.lt.s32.totalorder %s608_s17, %s602_s15 }
  0x1a   : > { %521 = vmatprep.subr.mxu0 %v664_v1  ;;  %531 = vmatpush3.msra.mxu1 %v322_v6  ;;  %v309_v21 = vld [vmem:[%s883_s3] sm:$0xff] }
  0x1b   : > { %522 = vmatpush3.msra.mxu0 %v221_v7  ;;  %532 = vmatprep.subr.mxu1 %v664_v1  ;;  %v486_v22 = vld [vmem:[%s882_s2] ss:$0 sm:$0xff]  ;;  %p611_p2 = por %p610_p1, %p609_p0 }
  0x1c   : > { %524 = vmatmul.mubr.msk.f32.vlgmr.msra.gmra.mxu0 %vm232_vm1, %v220_v8  ;;  %533 = vmatpush3.msra.mxu1 %v321_v9  ;;  %v488_v28 = vld [vmem:[%s884_s4] ss:$0 sm:$0xff] }
  0x1d   : > { %534 = vmatprep.subr.mxu1 %v664_v1  ;;  %558 = vmatprep.mubr.msk.f32.mxu1 %vm665_vm0, %v664_v1  ;;  %p612_p3 = pnand %p611_p2, %p605_p13 }
  0x1e   : > { %535 = vmatpush3.msra.mxu1 %v320_v10 }
  0x1f   : > { %536 = vmatprep.subr.mxu1 %v664_v1 }
  0x20   : > { %537 = vmatpush3.msra.mxu1 %v319_v11 }
  0x21   : > { %538 = vmatprep.subr.mxu1 %v664_v1 }
  0x22   : > { %539 = vmatpush3.msra.mxu1 %v318_v12 }
  0x23   : > { %540 = vmatprep.subr.mxu1 %v664_v1 }
  0x24   : > { %541 = vmatpush3.msra.mxu1 %v317_v13 }
  0x25   : > { %542 = vmatprep.subr.mxu1 %v664_v1 }
  0x26   : > { %543 = vmatpush3.msra.mxu1 %v316_v14 }
  0x27   : > { %544 = vmatprep.subr.mxu1 %v664_v1 }
  0x28   : > { %545 = vmatpush3.msra.mxu1 %v315_v15 }
  0x29   : > { %546 = vmatprep.subr.mxu1 %v664_v1 }
  0x2a   : > { %547 = vmatpush3.msra.mxu1 %v314_v16 }
  0x2b   : > { %548 = vmatprep.subr.mxu1 %v664_v1 }
  0x2c   : > { %549 = vmatpush3.msra.mxu1 %v313_v17 }
  0x2d   : > { %550 = vmatprep.subr.mxu1 %v664_v1 }
  0x2e   : > { %551 = vmatpush3.msra.mxu1 %v312_v18 }
  0x2f   : > { %552 = vmatprep.subr.mxu1 %v664_v1 }
  0x30   : > { %553 = vmatpush3.msra.mxu1 %v311_v19 }
  0x31   : > { %554 = vmatprep.subr.mxu1 %v664_v1 }
  0x32   : > { %555 = vmatpush3.msra.mxu1 %v310_v20 }
  0x33   : > { %556 = vmatprep.subr.mxu1 %v664_v1 }
  0x34   : > { %557 = vmatpush3.msra.mxu1 %v309_v21 }
  0xdc   : > { %v302_v23 = vpop.f32.mrf.mxu0 }
  0xdd   : > { %v303_v24 = vadd.f32 %v486_v22, %v302_v23 }
  0xde   : > { %v525_v25 = vpop.f32.mrf.mxu0 }
  0xdf   : > { %v307_v26 = vmul.f32 0.01, %v303_v24  ;;  %vm306_vm2 = vcmp.gt.f32.partialorder %v303_v24, 0.0 }
  0xe1   : > { %v308_v27 = vsel %vm306_vm2, %v303_v24, %v307_v26 }
  0xe2   : > { %559 = vmatmul.mubr.f32.vlgmr.msra.gmra.mxu1 %v308_v27 }
 0x1a2   : > { %v398_v29 = vpop.f32.mrf.mxu1 }
 0x1a3   : > { %v399_v30 = vadd.f32 %v488_v28, %v398_v29 }
 0x1a4   : > { %v560_v31 = vpop.f32.mrf.mxu1 }
 0x1a5   : > { %vm402_vm3 = vcmp.gt.f32.partialorder %v399_v30, 0.0  ;;  %v403_v32 = vmul.f32 0.01, %v399_v30 }
 0x1a7   : > { %v404_v33 = vsel %vm402_vm3, %v399_v30, %v403_v32 }
 0x1a8   : > { %406 = vst.msk [vmem:[%s215_s9] sm:$0xff] %vm405_vm4, %v404_v33 }
 0x1a9   : > { %615 = shalt.err (!%p612_p3)
}
 0x1aa   : > { %s616_s23 = scalar_lea.hbm %s845_s13, 128  ;;  %s620_s30 = scalar_lea.hbm %s885_s5, 256 }
 0x1ab   : > { %p617_p4 = scmp.ne.s32.totalorder %s845_s13, %s616_s23  ;;  %p621_p9 = scmp.lt.s32.totalorder %s845_s13, %s885_s5 }
 0x1ac   : > { %p622_p10 = scmp.lt.s32.totalorder %s620_s30, %s616_s23 }
 0x1ad   : > { %p618_p7 = pnand %p617_p4, %p735_p5 }
 0x1ae   : > { %p623_p11 = por %p622_p10, %p621_p9 }
 0x1af   : > { %p619_p8 = pneg %p618_p7 }
 0x1b1   : > { %p624_p12 = pnand %p623_p11, %p619_p8 }
 0x1b3   : > { %627 = shalt.err (!%p624_p12)
}
 0x1b4   : > { %561 = dma.vmem_to_hbm [thread:$0]  (%p735_p5), %s422_s10, 128, %s845_s13, %s408_s14  }
 0x1b5 PF: > { %p567_p13 = scmp.ge.s32.totalorder %s662_s21, 2  ;;  %s433_s8 = sand.u32 1, %s650_s18  }
 0x1b6   : > { %s434_s9 = scalar_lea.sflag [#allocation3], %s433_s8 }
 0x1b7   : > { %p564_p0 = pnand %p567_p13, %p739_p6 }
 0x1b9   : > { %p565_p1 = pneg %p564_p0 }
 0x1bb   : > { %645 = dma.done.wait (%p565_p1), %s434_s9, 128  }
 0x1bc   : > { %647 = vsyncadd (%p565_p1), %s434_s9, 4294967168  ;;  %p15_p2 = scmp.ge.s32.totalorder %s722_s24, 4   ;;  %s888_s18 = smov %s654_s19 }
 0x1bd   : > { %s889_s19 = smov %s658_s20  ;;  %s890_s20 = smov %s733_s27 }
 0x1be   : > { %s891_s21 = smov %s722_s24  ;;  %17 = sbr.rel (!%p15_p2) target bundleno = 3 (0x3), region = 75 }
 0x1c3   :  { %439 = vsyncpa [#allocation3], 1 }
 0x1c4   :  { %441 = vsyncpa [#allocation3 + $0x1], 1 }

</bundles_post_ra>
